<compile_context>
chip_gen: v6e
topology: v6e:2x2x1
jax: 0.10.0
libtpu: 0.0.40
codegen_flags: <defaults>
</compile_context>

<pallas_src>
import functools

import jax
import jax.numpy as jnp
from jax.experimental import pallas as pl
from jax.experimental.pallas import tpu as pltpu

LANE = 128


def _round_up(x, m):
    return (x + m - 1) // m * m


def _pad2(x, rows, cols):
    return jnp.pad(x, ((0, rows - x.shape[0]), (0, cols - x.shape[1])))


# --------------------------- feature-transform kernel -------------------------
# H = X @ W  (bf16 operands, f32 MXU accumulation, bf16 out), row-tiled.

def _transform_kernel(x_ref, w_ref, o_ref):
    o_ref[...] = jnp.dot(x_ref[...], w_ref[...],
                         preferred_element_type=jnp.float32).astype(o_ref.dtype)


def linear_transform(x, w, *, tm):
    n_pad, f_in = x.shape
    d = w.shape[1]
    return pl.pallas_call(
        _transform_kernel,
        out_shape=jax.ShapeDtypeStruct((n_pad, d), jnp.bfloat16),
        grid_spec=pltpu.PrefetchScalarGridSpec(
            num_scalar_prefetch=0,
            grid=(n_pad // tm,),
            in_specs=[
                pl.BlockSpec((tm, f_in), lambda i: (i, 0)),
                pl.BlockSpec((f_in, d), lambda i: (0, 0)),
            ],
            out_specs=pl.BlockSpec((tm, d), lambda i: (i, 0)),
        ),
        compiler_params=pltpu.CompilerParams(dimension_semantics=("parallel",)),
    )(x, w)


# ----------------------------- aggregation kernel ------------------------------
# out = (relu?)(A_hat @ H + b) [@ W_next]   tiled over (row tiles i, k tiles),
# f32 VMEM accumulator, init/finalize via pl.when on the k axis.

def _aggregate_kernel(a_ref, h_ref, b_ref, *rest, apply_relu, fuse_next):
    if fuse_next:
        wn_ref, o_ref, acc_ref = rest
    else:
        o_ref, acc_ref = rest
    k = pl.program_id(1)

    @pl.when(k == 0)
    def _init():
        acc_ref[...] = jnp.zeros_like(acc_ref)

    # Bandwidth-bound aggregation: bf16 operands, f32 accumulation on the MXU.
    acc_ref[...] += jnp.dot(a_ref[...], h_ref[...],
                            preferred_element_type=jnp.float32)

    @pl.when(k == pl.num_programs(1) - 1)
    def _finalize():
        out = acc_ref[...] + b_ref[...]
        if apply_relu:
            out = jnp.maximum(out, 0.0)
        if fuse_next:
            # Next layer's feature transform, applied once per row tile (hoisted
            # out of the k loop); bf16 operands, f32 accumulation.
            out = jnp.dot(out.astype(jnp.bfloat16), wn_ref[...],
                          preferred_element_type=jnp.float32)
        o_ref[...] = out.astype(o_ref.dtype)


def aggregate(a_hat, h, b, w_next, *, apply_relu, tm, tk):
    n_pad = a_hat.shape[0]
    d = h.shape[1]
    fuse_next = w_next is not None
    d_out = w_next.shape[1] if fuse_next else d
    grid = (n_pad // tm, n_pad // tk)

    # Deeper pipelining on the dominant (A_hat) stream when the k grid is deep
    # enough to benefit; 2-deep default otherwise.
    if grid[1] >= 3:
        a_spec = pl.BlockSpec((tm, tk), lambda i, k: (i, k),
                              pipeline_mode=pl.Buffered(3))
    else:
        a_spec = pl.BlockSpec((tm, tk), lambda i, k: (i, k))

    in_specs = [
        a_spec,                                            # A_hat tile (bf16)
        pl.BlockSpec((tk, d), lambda i, k: (k, 0)),        # H tile (bf16)
        pl.BlockSpec((1, d), lambda i, k: (0, 0)),         # bias (f32, resident)
    ]
    args = [a_hat, h, b]
    if fuse_next:
        in_specs.append(pl.BlockSpec((d, d_out), lambda i, k: (0, 0)))  # W_next (bf16, resident)
        args.append(w_next)

    return pl.pallas_call(
        functools.partial(_aggregate_kernel, apply_relu=apply_relu,
                          fuse_next=fuse_next),
        out_shape=jax.ShapeDtypeStruct((n_pad, d_out), jnp.bfloat16),
        grid_spec=pltpu.PrefetchScalarGridSpec(
            num_scalar_prefetch=0,
            grid=grid,
            in_specs=in_specs,
            out_specs=pl.BlockSpec((tm, d_out), lambda i, k: (i, 0)),
            scratch_shapes=[pltpu.VMEM((tm, d), jnp.float32)],
        ),
        compiler_params=pltpu.CompilerParams(
            dimension_semantics=("parallel", "arbitrary"),
            vmem_limit_bytes=32 * 1024 * 1024),
    )(*args)


# ------------------------------- edge-MLP kernel -------------------------------
# score = sum(relu(h_src @ W1s + h_dst @ W1d + b1) * w2_row) + b2
# Inputs are lane-dense (128 padded, zero) feature columns; output is a [E,1] f32
# column (only 4 B/edge of real payload).

def _edge_mlp_kernel(hs_ref, hd_ref, w1s_ref, w1d_ref, b1_ref, w2_ref, b2_ref, o_ref):
    h = jnp.dot(hs_ref[...], w1s_ref[...], preferred_element_type=jnp.float32)
    h = h + jnp.dot(hd_ref[...], w1d_ref[...], preferred_element_type=jnp.float32)
    h = jnp.maximum(h + b1_ref[...], 0.0)
    # Final Linear(hidden, 1): VPU multiply + cross-lane reduce (XLU), no dead matmul.
    s = jnp.sum(h * w2_ref[...], axis=-1, keepdims=True) + b2_ref[...]
    o_ref[...] = s.astype(o_ref.dtype)


def edge_mlp(hs, hd, w1s, w1d, b1, w2_row, b2, *, te):
    e_pad, d_pad = hs.shape
    hid_pad = w1s.shape[1]
    out = pl.pallas_call(
        _edge_mlp_kernel,
        out_shape=jax.ShapeDtypeStruct((e_pad, 1), jnp.float32),
        grid_spec=pltpu.PrefetchScalarGridSpec(
            num_scalar_prefetch=0,
            grid=(e_pad // te,),
            in_specs=[
                pl.BlockSpec((te, d_pad), lambda i: (i, 0)),        # h[src] (bf16)
                pl.BlockSpec((te, d_pad), lambda i: (i, 0)),        # h[dst] (bf16)
                pl.BlockSpec((d_pad, hid_pad), lambda i: (0, 0)),   # W1_src (bf16)
                pl.BlockSpec((d_pad, hid_pad), lambda i: (0, 0)),   # W1_dst (bf16)
                pl.BlockSpec((1, hid_pad), lambda i: (0, 0)),       # b1 (f32)
                pl.BlockSpec((1, hid_pad), lambda i: (0, 0)),       # w2 row (f32)
                pl.BlockSpec((1, 1), lambda i: (0, 0)),             # b2 (f32)
            ],
            out_specs=pl.BlockSpec((te, 1), lambda i: (i, 0)),
        ),
        compiler_params=pltpu.CompilerParams(dimension_semantics=("parallel",)),
    )(hs, hd, w1s, w1d, b1, w2_row, b2)
    return out[:, 0]


# -------------------------------- JAX glue ------------------------------------

def build_normalized_adjacency(edge_index, num_nodes, n_pad=None, dtype=jnp.float32):
    """PyG GCNConv normalization: add self loops, A_hat = D^-1/2 (A+I) D^-1/2.

    Scatters directly into a buffer of the requested dtype (no f32 [N,N]
    intermediate + cast pass when dtype=bf16)."""
    if n_pad is None:
        n_pad = num_nodes
    src, dst = edge_index[0], edge_index[1]
    loop = jnp.arange(num_nodes, dtype=src.dtype)
    src_sl = jnp.concatenate([src, loop])
    dst_sl = jnp.concatenate([dst, loop])
    deg = jnp.zeros((num_nodes,), jnp.float32).at[dst_sl].add(1.0)
    dinv = jnp.where(deg > 0, 1.0 / jnp.sqrt(deg), 0.0)
    norm = dinv[src_sl] * dinv[dst_sl]
    a_hat = jnp.zeros((n_pad, n_pad), dtype).at[dst_sl, src_sl].add(norm.astype(dtype))
    return a_hat


def init_params(key, input_dim, hidden_dim, output_dim):
    ks = jax.random.split(key, 4)

    def lin(k, din, dout):
        scale = 1.0 / jnp.sqrt(jnp.float32(din))
        kw, kb = jax.random.split(k)
        w = jax.random.uniform(kw, (din, dout), jnp.float32, -scale, scale)
        b = jax.random.uniform(kb, (dout,), jnp.float32, -scale, scale)
        return w, b

    p = {}
    p["gcn0_w"], p["gcn0_b"] = lin(ks[0], input_dim, hidden_dim)
    p["gcn1_w"], p["gcn1_b"] = lin(ks[1], hidden_dim, output_dim)
    p["ep1_w"], p["ep1_b"] = lin(ks[2], 2 * output_dim, hidden_dim)
    p["ep2_w"], p["ep2_b"] = lin(ks[3], hidden_dim, 1)
    return p


def _choose_node_tiles(n):
    # Large graphs: tm=1024, tk=2048 -> A tile 4 MiB bf16, <=12 MiB triple-buffered;
    # fits v5e's raised 32 MiB scoped VMEM and v7x's 64 MiB physical, and keeps
    # n_pad//tm >= 2 so both v7x TensorCores get row tiles.
    if n >= 2048:
        n_pad = _round_up(n, 2048)
        return n_pad, 1024, 2048
    n_pad = _round_up(n, LANE)
    tm = n_pad // 2 if n_pad >= 256 else n_pad   # >=2 row tiles when possible (v7x)
    return n_pad, tm, n_pad


def forward(params, x, edge_index):
    n, f_in = x.shape
    hidden = params["gcn0_w"].shape[1]
    d_out = params["gcn1_w"].shape[1]
    h_pad = _round_up(hidden, LANE)
    d_pad = _round_up(d_out, LANE)

    n_pad, tm, tk = _choose_node_tiles(n)
    # bf16 A_hat halves the dominant HBM stream; accumulation stays f32 in-kernel.
    a_hat = build_normalized_adjacency(edge_index, n, n_pad, dtype=jnp.bfloat16)
    x_p = jnp.pad(x, ((0, n_pad - n), (0, 0))).astype(jnp.bfloat16)

    w0 = _pad2(params["gcn0_w"], f_in, h_pad).astype(jnp.bfloat16)
    b0 = _pad2(params["gcn0_b"].reshape(1, -1), 1, h_pad)                 # f32
    w1 = _pad2(params["gcn1_w"], h_pad, d_pad).astype(jnp.bfloat16)
    b1 = _pad2(params["gcn1_b"].reshape(1, -1), 1, d_pad)                 # f32

    # Layer 0 transform hoisted out of the aggregation loop.
    h0 = linear_transform(x_p, w0, tm=tm)                                 # X @ W0
    # Layer 0 aggregate + ReLU (dropout = identity in eval mode), with layer-1
    # transform fused into the finalize phase: relu(A@H0 + b0) @ W1.
    h1 = aggregate(a_hat, h0, b0, w1, apply_relu=True, tm=tm, tk=tk)
    # Layer 1 aggregate: h = A@H1 + b1.
    h = aggregate(a_hat, h1, b1, None, apply_relu=False, tm=tm, tk=tk)

    # Edge gather (XLA glue). Keep the lane-dense 128 padded columns of h (the
    # padded columns are exactly zero); the 2*d_out concat is never materialized.
    src, dst = edge_index[0], edge_index[1]
    e = src.shape[0]
    te = 256 if e >= 256 else _round_up(e, 8)
    e_pad = _round_up(e, te)
    src_p = jnp.pad(src, (0, e_pad - e))       # padded indices point at valid row 0;
    dst_p = jnp.pad(dst, (0, e_pad - e))       # their scores are dropped below.
    hs = h[src_p]
    hd = h[dst_p]

    hid = params["ep1_w"].shape[1]
    hid_pad = _round_up(hid, LANE)
    # Split ep1_w into src/dst halves and zero-pad rows to d_pad (lane-dense inputs).
    w1s = _pad2(params["ep1_w"][:d_out], d_pad, hid_pad).astype(jnp.bfloat16)
    w1d = _pad2(params["ep1_w"][d_out:], d_pad, hid_pad).astype(jnp.bfloat16)
    b1e = _pad2(params["ep1_b"].reshape(1, -1), 1, hid_pad)               # f32
    w2r = _pad2(params["ep2_w"][:, 0].reshape(1, -1), 1, hid_pad)         # f32 row
    b2 = params["ep2_b"].reshape(1, 1)                                    # f32 (1,1)

    scores = edge_mlp(hs, hd, w1s, w1d, b1e, w2r, b2, te=te)
    return scores[:e]


def forward_reference(params, x, edge_index):
    """Pure-JAX f32 reference (exact module semantics, eval mode)."""
    n = x.shape[0]
    a_hat = build_normalized_adjacency(edge_index, n)
    h = jnp.maximum(a_hat @ (x @ params["gcn0_w"]) + params["gcn0_b"], 0.0)
    h = a_hat @ (h @ params["gcn1_w"]) + params["gcn1_b"]
    src, dst = edge_index[0], edge_index[1]
    ef = jnp.concatenate([h[src], h[dst]], axis=-1)
    hh = jnp.maximum(ef @ params["ep1_w"] + params["ep1_b"], 0.0)
    return (hh @ params["ep2_w"] + params["ep2_b"])[:, 0]


# ---------------------------------- main --------------------------------------

if __name__ == "__main__":
    key = jax.random.PRNGKey(0)
    k_x, k_e, k_p = jax.random.split(key, 3)

    num_nodes = 16
    num_edges = 24
    input_dim, hidden_dim, output_dim = 8, 32, 16

    x = jax.random.normal(k_x, (num_nodes, input_dim), jnp.float32)
    edge_index = jax.random.randint(k_e, (2, num_edges), 0, num_nodes, jnp.int32)

    params = init_params(k_p, input_dim, hidden_dim, output_dim)

    scores = jax.block_until_ready(forward(params, x, edge_index))
    ref = forward_reference(params, x, edge_index)

    assert scores.shape == (num_edges,)
    max_diff = float(jnp.max(jnp.abs(scores - ref)))
    assert jnp.allclose(scores, ref, atol=5e-2, rtol=5e-2), \
        f"mismatch vs reference (max abs diff {max_diff})"

    print("KERNEL_OK")
</pallas_src>

<mosaic_0001>
module attributes {stable_mosaic.version = 11 : i64} {
  func.func @_transform_kernel(%arg0: i32, %arg1: memref<128x8xbf16, #tpu.memory_space<vmem>>, %arg2: memref<8x128xbf16, #tpu.memory_space<vmem>>, %arg3: memref<128x128xbf16, #tpu.memory_space<vmem>>) attributes {dimension_semantics = [#tpu.dimension_semantics<parallel>], iteration_bounds = array<i64: 1>, scalar_prefetch = 0 : i64, scratch_operands = 0 : i64, tpu.core_type = #tpu.core_type<tc>, window_params = [{transform_indices = @transform_0, window_bounds = array<i64: 128, 8>}, {pipeline_mode = #tpu.pipeline_mode<synchronous>, transform_indices = @transform_1, window_bounds = array<i64: 8, 128>}, {transform_indices = @transform_2, window_bounds = array<i64: 128, 128>}]} {
    %c0 = arith.constant 0 : index
    %c0_0 = arith.constant 0 : index
    %0 = vector.load %arg1[%c0, %c0_0] : memref<128x8xbf16, #tpu.memory_space<vmem>>, vector<128x8xbf16>
    %c0_1 = arith.constant 0 : index
    %c0_2 = arith.constant 0 : index
    %1 = vector.load %arg2[%c0_1, %c0_2] : memref<8x128xbf16, #tpu.memory_space<vmem>>, vector<8x128xbf16>
    %cst = arith.constant dense<0.000000e+00> : vector<128x128xf32>
    %2 = tpu.matmul %0, %1, %cst {dimension_numbers = #tpu.dot_dimension_numbers<[1], [0], [0], [1], [0, 0, 1, 1], [], []>} : vector<128x8xbf16>, vector<8x128xbf16>, vector<128x128xf32> -> vector<128x128xf32>
    %3 = arith.truncf %2 : vector<128x128xf32> to vector<128x128xbf16>
    %c0_3 = arith.constant 0 : index
    %c0_4 = arith.constant 0 : index
    %4 = vector.load %arg3[%c0_3, %c0_4] : memref<128x128xbf16, #tpu.memory_space<vmem>>, vector<128x128xbf16>
    tpu.vector_store %arg3[%c0_3, %c0_4], %3 {strides = array<i32>} : memref<128x128xbf16, #tpu.memory_space<vmem>>, vector<128x128xbf16>,
    return
  }
  func.func @transform_0(%arg0: i32) -> (i32, i32) {
    %c0_i32 = arith.constant 0 : i32
    %c0_i32_0 = arith.constant 0 : i32
    return %arg0, %c0_i32 : i32, i32
  }
  func.func @transform_1(%arg0: i32) -> (i32, i32) {
    %c0_i32 = arith.constant 0 : i32
    %c0_i32_0 = arith.constant 0 : i32
    %c0_i32_1 = arith.constant 0 : i32
    return %c0_i32, %c0_i32_0 : i32, i32
  }
  func.func @transform_2(%arg0: i32) -> (i32, i32) {
    %c0_i32 = arith.constant 0 : i32
    %c0_i32_0 = arith.constant 0 : i32
    return %arg0, %c0_i32 : i32, i32
  }
}

</mosaic_0001>

<bundles_post_ra>
// kernel: tpu_custom_call.1
= control target key start
LH: loop header
LB: loop body
LE: loop exit
PB: predicated region body
PF: predicated region fallthrough
CT: control target
= control target key end

     0   :  { %vm95_vm0 = vcmask 1043456   ;;  %vm70_vm1 = vcmask 64512   ;;  %s507_s0 = inlined_call_operand.vmem [shape: bf16[128,8], index: 0, kind: input, shape index: {}]   ;;  %s508_s1 = inlined_call_operand.vmem [shape: bf16[8,128], index: 1, kind: input, shape index: {}]   ;;  %s509_s2 = inlined_call_operand.hbm [shape: bf16[128,128], index: 2, kind: output, shape index: {}]  }
   0x1   :  { %v29_v0 = vld [vmem:[%s508_s1] sm:$0xf]  ;;  %v423_v4 = vld [vmem:[%s507_s0 + $0x8] sm:$0xff]   ;;  %v425_v6 = vld [vmem:[%s507_s0 + $0x10] sm:$0xff]  }
   0x2   :  { %v421_v1 = vld [vmem:[%s507_s0] sm:$0xff]   ;;  %416 = vmatprep.subr.msk.bf16.mxu0 %vm95_vm0, %v29_v0  ;;  %417 = vmatprep.subr.msk.bf16.mxu1 %vm95_vm0, %v29_v0  ;;  %v97_v2 = vsel %vm95_vm0, %v29_v0, 0  ;;  %v424_v5 = vld [vmem:[%s507_s0 + $0x28] sm:$0xff]   ;;  %v426_v7 = vld [vmem:[%s507_s0 + $0x30] sm:$0xff]  }
   0x3   :  { %397 = vmatpush3.bf16.msra.mxu0 %v97_v2  ;;  %415 = vmatpush3.bf16.msra.mxu1 %v97_v2  ;;  %v422_v3 = vld [vmem:[%s507_s0 + $0x20] sm:$0xff]  }
   0x4   :  { %398 = vmatprep.mubr.msk.bf16.mxu0 %vm70_vm1, %v421_v1  ;;  %406 = vmatprep.mubr.msk.bf16.mxu1 %vm70_vm1, %v422_v3 }
   0x6   :  { %399 = vmatmul.mubr.msk.bf16.vlgmr.msra.gmra.mxu0 %vm70_vm1, %v423_v4  ;;  %407 = vmatmul.mubr.msk.bf16.vlgmr.msra.gmra.mxu1 %vm70_vm1, %v424_v5 }
   0x7   :  { %402 = vmatprep.mubr.msk.bf16.mxu0 %vm70_vm1, %v425_v6  ;;  %410 = vmatprep.mubr.msk.bf16.mxu1 %vm70_vm1, %v426_v7 }
   0x8   :  { %7 = vsyncpa [#allocation3], 0  ;;  %v427_v8 = vld [vmem:[%s507_s0 + $0x18] sm:$0xff]  }
   0x9   :  { %v428_v9 = vld [vmem:[%s507_s0 + $0x38] sm:$0xff]   ;;  %s451_s0 = smov [#allocation2]  }
   0xa   :  { %s281_s26 = sshll.u32 %s451_s0, 4  ;;  %s282_s26 = int_to_ptr.vmem [resolvable:$true] %s281_s26 }
   0xb   :  { %s429_s27 = scalar_lea.vmem %s282_s26, 1024  ;;  %p434_p1 = scmp.lt.s32.totalorder %s282_s26, %s282_s26 }
   0xc   :  { %p430_p0 = scmp.ne.s32.totalorder %s282_s26, %s429_s27  ;;  %p435_p2 = scmp.lt.s32.totalorder %s429_s27, %s429_s27 }
   0xe   :  { %403 = vmatmul.mubr.msk.bf16.gmra.mxu0 %vm70_vm1, %v427_v8  ;;  %411 = vmatmul.mubr.msk.bf16.gmra.mxu1 %vm70_vm1, %v428_v9  ;;  %p436_p3 = por %p435_p2, %p434_p1 }
  0x10   :  { %p437_p4 = pnand %p436_p3, %p430_p0 }
  0xc6   :  { %v400_v10 = vpop.f32.mrf.mxu0  ;;  %v408_v11 = vpop.f32.mrf.mxu1 }
  0xc8   :  { %v133_v12 = vpop.f32.mrf.mxu0  ;;  %v165_v13 = vpop.f32.mrf.mxu1 }
  0xca   :  { %v401_v14 = vpop.f32.mrf.mxu0  ;;  %v409_v16 = vpop.f32.mrf.mxu1 }
  0xcb   :  { %v348_v15 = vpack.c.bf16 %v401_v14, %v400_v10  ;;  %v368_v17 = vpack.c.bf16 %v409_v16, %v408_v11 }
  0xcc   :  { %v136_v18 = vpop.f32.mrf.mxu0  ;;  %v168_v20 = vpop.f32.mrf.mxu1 }
  0xcd   :  { %380 = vst [vmem:[#allocation2 + $0x8] sm:$0xff] %v348_v15   ;;  %v343_v19 = vpack.c.bf16 %v136_v18, %v133_v12  ;;  %384 = vst [vmem:[#allocation2 + $0x28] sm:$0xff] %v368_v17   ;;  %v363_v21 = vpack.c.bf16 %v168_v20, %v165_v13 }
  0xce   :  { %v404_v22 = vpop.f32.mrf.mxu0  ;;  %v412_v23 = vpop.f32.mrf.mxu1 }
  0xcf   :  { %344 = vst [vmem:[#allocation2] sm:$0xff] %v343_v19   ;;  %383 = vst [vmem:[#allocation2 + $0x20] sm:$0xff] %v363_v21  }
  0xd0   :  { %v149_v24 = vpop.f32.mrf.mxu0  ;;  %v181_v25 = vpop.f32.mrf.mxu1 }
  0xd2   :  { %v405_v26 = vpop.f32.mrf.mxu0  ;;  %v413_v28 = vpop.f32.mrf.mxu1 }
  0xd3   :  { %v358_v27 = vpack.c.bf16 %v405_v26, %v404_v22  ;;  %v378_v29 = vpack.c.bf16 %v413_v28, %v412_v23 }
  0xd4   :  { %v152_v30 = vpop.f32.mrf.mxu0  ;;  %v184_v32 = vpop.f32.mrf.mxu1 }
  0xd5   :  { %382 = vst [vmem:[#allocation2 + $0x18] sm:$0xff] %v358_v27   ;;  %v353_v31 = vpack.c.bf16 %v152_v30, %v149_v24  ;;  %386 = vst [vmem:[#allocation2 + $0x38] sm:$0xff] %v378_v29   ;;  %v373_v33 = vpack.c.bf16 %v184_v32, %v181_v25 }
  0xd7   :  { %381 = vst [vmem:[#allocation2 + $0x10] sm:$0xff] %v353_v31   ;;  %385 = vst [vmem:[#allocation2 + $0x30] sm:$0xff] %v373_v33  }
  0xd8   :  { %440 = shalt.err (!%p437_p4)
}
  0xd9   :  { %s452_s28 = smov 64   ;;  %s453_s29 = smov 4  }
  0xda   :  { %287 = dma.vmem_to_hbm [thread:$0]  %s282_s26, 1024, %s509_s2, [#allocation3], %s452_s28, %s452_s28, %s453_s29  }
  0xdb   :  { %449 = dma.done.wait [#allocation3], 1024  }
  0xdc   :  { %450 = vsyncadd [#allocation3], 4294966272 }
  0xdd   :  { %291 = vsyncpa [#allocation3], 1 }

</bundles_post_ra>
